<compile_context>
chip_gen: v7x
topology: tpu7x:2x2x1
jax: 0.10.0
libtpu: 0.0.40
codegen_flags: <defaults>
</compile_context>

<pallas_src>
import functools

import jax
import jax.numpy as jnp
from jax.experimental import pallas as pl
from jax.experimental.pallas import tpu as pltpu


def _round_up(x, m):
    return ((x + m - 1) // m) * m


def _vmem_capacity_bytes():
    """Physical VMEM of the local TPU generation (conservative fallback)."""
    try:
        return int(pltpu.get_tpu_info().vmem_capacity_bytes)
    except Exception:
        return 64 << 20            # v7x-sized fallback: safe on every gen


def _patch_embed_kernel(x_ref, w_ref, b_ref, o_ref):
    # x_ref: (TM, K_pad)    bf16 patch rows (streamed / double-buffered)
    # w_ref: (K_pad, D_pad) bf16 flattened conv weight (constant block -> resident)
    # b_ref: (1, D_pad)     f32 bias (constant block -> resident)
    # o_ref: (TM, D_pad)    output tile
    acc = jnp.dot(x_ref[...], w_ref[...], preferred_element_type=jnp.float32)
    o_ref[...] = (acc + b_ref[...]).astype(o_ref.dtype)


def _pick_tm(m, k_pad, d_pad, out_itemsize, budget_bytes):
    """Largest row tile whose pipelined footprint fits the VMEM budget while
    keeping >= 2 grid steps (so both v7x TensorCores get work)."""
    if m <= 8:
        return m                               # tiny problem: one full-extent block
    # Pallas double-buffers every input by default, including the
    # constant-index weight/bias blocks -> count them twice.
    resident = 2 * k_pad * d_pad * 2 + 2 * 8 * d_pad * 4
    half_m = _round_up(max(pl.cdiv(m, 2), 8), 8)
    tm = 8192
    while tm > 8:
        streamed = 2 * tm * k_pad * 2 + 2 * tm * d_pad * out_itemsize
        if resident + streamed <= budget_bytes:
            break
        tm //= 2
    return max(8, min(tm, half_m))


@functools.partial(jax.jit, static_argnames=("patch_size", "out_dtype"))
def patch_embed(x, weight, bias, *, patch_size, out_dtype=None):
    """
    x:      (N, C, T, H, W) float32
    weight: (D, C, pt, ph, pw)  -- Conv3d weight layout
    bias:   (D,)
    patch_size: (pt, ph, pw) == conv kernel == conv stride
    out_dtype:  output dtype (default: x.dtype); pass bf16 for bf16 stacks.
    returns: (N, P, D) where P = (T//pt)*(H//ph)*(W//pw)
    """
    N, C, T, H, W = x.shape
    pt, ph, pw = patch_size
    D = weight.shape[0]
    assert T % pt == 0 and H % ph == 0 and W % pw == 0

    nt, nh, nw = T // pt, H // ph, W // pw
    P = nt * nh * nw
    K = C * pt * ph * pw
    M = N * P
    out_dtype = jnp.dtype(out_dtype) if out_dtype is not None else x.dtype
    out_itemsize = jnp.dtype(out_dtype).itemsize

    # bf16 operands for the MXU (f32 accumulation in-kernel).  Casting before
    # the patchify transpose halves that copy pass's HBM write bytes.
    x_bf = x.astype(jnp.bfloat16)
    w_bf = weight.astype(jnp.bfloat16)

    # --- patchify: (N,C,T,H,W) -> (N*P, K) with (C,pt,ph,pw) flatten order.
    # One materialized XLA copy pass feeding the kernel (see TODO above).
    xp = x_bf.reshape(N, C, nt, pt, nh, ph, nw, pw)
    xp = xp.transpose(0, 2, 4, 6, 1, 3, 5, 7)
    patches = xp.reshape(M, K)

    w_mat = w_bf.reshape(D, K).T                       # (K, D) bf16

    # --- pad only the small / column extents (never a full M-row copy) ------
    K_pad = _round_up(K, 128)                          # lane-dense K
    D_pad = _round_up(D, 256 if D >= 256 else 128)     # 256-wide MXU on v6e/v7x

    if K_pad != K:                                     # zero-fill: same matmul
        patches = jnp.pad(patches, ((0, 0), (0, K_pad - K)))
        w_mat = jnp.pad(w_mat, ((0, K_pad - K), (0, 0)))
    if D_pad != D:
        w_mat = jnp.pad(w_mat, ((0, 0), (0, D_pad - D)))
        b_vec = jnp.pad(bias, (0, D_pad - D))
    else:
        b_vec = bias
    b_mat = b_vec.astype(jnp.float32).reshape(1, D_pad)

    # --- generation-aware tiling / VMEM budget -------------------------------
    cap = _vmem_capacity_bytes()
    budget = max(16 << 20, cap // 2)                   # ~64 MiB v5e/v6e, ~32 MiB v7x
    TM = _pick_tm(M, K_pad, D_pad, out_itemsize, budget)
    grid_m = pl.cdiv(M, TM)                            # ragged last block is masked
    need = (2 * K_pad * D_pad * 2 + 2 * 8 * D_pad * 4
            + 2 * TM * K_pad * 2 + 2 * TM * D_pad * out_itemsize)
    vmem_limit = int(min(max(budget, need + (2 << 20)),
                         max(cap - (4 << 20), 16 << 20)))

    out = pl.pallas_call(
        _patch_embed_kernel,
        out_shape=jax.ShapeDtypeStruct((M, D_pad), out_dtype),
        grid=(grid_m,),
        in_specs=[
            pl.BlockSpec((TM, K_pad), lambda i: (i, 0)),      # streamed patch rows
            pl.BlockSpec((K_pad, D_pad), lambda i: (0, 0)),   # resident weight
            pl.BlockSpec((1, D_pad), lambda i: (0, 0)),       # resident bias
        ],
        out_specs=pl.BlockSpec((TM, D_pad), lambda i: (i, 0)),
        compiler_params=pltpu.CompilerParams(
            dimension_semantics=("parallel",),
            vmem_limit_bytes=vmem_limit,
        ),
    )(patches, w_mat, b_mat)

    return out[:, :D].reshape(N, P, D)


if __name__ == "__main__":
    key = jax.random.PRNGKey(0)
    k_x, k_w, k_b = jax.random.split(key, 3)

    # Small, module-consistent shapes.
    N, C, T, H, W = 2, 4, 4, 16, 16
    patch_size = (2, 8, 8)
    D = 32  # embedding dim

    x = jax.random.normal(k_x, (N, C, T, H, W), dtype=jnp.float32)
    weight = jax.random.normal(
        k_w, (D, C) + patch_size, dtype=jnp.float32) * 0.02
    bias = jax.random.normal(k_b, (D,), dtype=jnp.float32) * 0.02

    out = patch_embed(x, weight, bias, patch_size=patch_size)
    out = jax.block_until_ready(out)

    P = (T // patch_size[0]) * (H // patch_size[1]) * (W // patch_size[2])
    assert out.shape == (N, P, D)

    # Reference: Conv3d(stride==kernel) + flatten(2) + transpose(1,2) semantics.
    ref = jax.lax.conv_general_dilated(
        x, weight, window_strides=patch_size, padding="VALID",
        dimension_numbers=("NCDHW", "OIDHW", "NCDHW"))
    ref = ref.reshape(N, D, -1).transpose(0, 2, 1) + bias.reshape(1, 1, D)

    # bf16 inputs / f32 accumulation -> slightly looser tolerance vs pure f32.
    assert jnp.allclose(out, ref, atol=3e-2, rtol=3e-2), float(
        jnp.max(jnp.abs(out - ref)))

    print("KERNEL_OK")
</pallas_src>

<mosaic_0001>
module attributes {stable_mosaic.version = 11 : i64} {
  func.func @_patch_embed_kernel(%arg0: i32, %arg1: memref<8x512xbf16, #tpu.memory_space<vmem>>, %arg2: memref<512x128xbf16, #tpu.memory_space<vmem>>, %arg3: memref<1x128xf32, #tpu.memory_space<vmem>>, %arg4: memref<8x128xf32, #tpu.memory_space<vmem>>) attributes {dimension_semantics = [#tpu.dimension_semantics<parallel>], iteration_bounds = array<i64: 2>, scalar_prefetch = 0 : i64, scratch_operands = 0 : i64, tpu.core_type = #tpu.core_type<tc>, window_params = [{transform_indices = @transform_0, window_bounds = array<i64: 8, 512>}, {pipeline_mode = #tpu.pipeline_mode<synchronous>, transform_indices = @transform_1, window_bounds = array<i64: 512, 128>}, {pipeline_mode = #tpu.pipeline_mode<synchronous>, transform_indices = @transform_2, window_bounds = array<i64: 1, 128>}, {transform_indices = @transform_3, window_bounds = array<i64: 8, 128>}]} {
    %c0 = arith.constant 0 : index
    %c0_0 = arith.constant 0 : index
    %0 = vector.load %arg1[%c0, %c0_0] : memref<8x512xbf16, #tpu.memory_space<vmem>>, vector<8x512xbf16>
    %c0_1 = arith.constant 0 : index
    %c0_2 = arith.constant 0 : index
    %1 = vector.load %arg2[%c0_1, %c0_2] : memref<512x128xbf16, #tpu.memory_space<vmem>>, vector<512x128xbf16>
    %cst = arith.constant dense<0.000000e+00> : vector<8x128xf32>
    %2 = tpu.matmul %0, %1, %cst {dimension_numbers = #tpu.dot_dimension_numbers<[1], [0], [0], [1], [0, 0, 1, 1], [], []>} : vector<8x512xbf16>, vector<512x128xbf16>, vector<8x128xf32> -> vector<8x128xf32>
    %c0_3 = arith.constant 0 : index
    %c0_4 = arith.constant 0 : index
    %3 = vector.load %arg3[%c0_3, %c0_4] : memref<1x128xf32, #tpu.memory_space<vmem>>, vector<1x128xf32>
    %4 = vector.broadcast %3 : vector<1x128xf32> to vector<8x128xf32>
    %5 = arith.addf %2, %4 : vector<8x128xf32>
    %c0_5 = arith.constant 0 : index
    %c0_6 = arith.constant 0 : index
    %6 = vector.load %arg4[%c0_5, %c0_6] : memref<8x128xf32, #tpu.memory_space<vmem>>, vector<8x128xf32>
    tpu.vector_store %arg4[%c0_5, %c0_6], %5 {strides = array<i32>} : memref<8x128xf32, #tpu.memory_space<vmem>>, vector<8x128xf32>,
    return
  }
  func.func @transform_0(%arg0: i32) -> (i32, i32) {
    %c0_i32 = arith.constant 0 : i32
    %c0_i32_0 = arith.constant 0 : i32
    return %arg0, %c0_i32 : i32, i32
  }
  func.func @transform_1(%arg0: i32) -> (i32, i32) {
    %c0_i32 = arith.constant 0 : i32
    %c0_i32_0 = arith.constant 0 : i32
    %c0_i32_1 = arith.constant 0 : i32
    return %c0_i32, %c0_i32_0 : i32, i32
  }
  func.func @transform_2(%arg0: i32) -> (i32, i32) {
    %c0_i32 = arith.constant 0 : i32
    %c0_i32_0 = arith.constant 0 : i32
    %c0_i32_1 = arith.constant 0 : i32
    return %c0_i32, %c0_i32_0 : i32, i32
  }
  func.func @transform_3(%arg0: i32) -> (i32, i32) {
    %c0_i32 = arith.constant 0 : i32
    %c0_i32_0 = arith.constant 0 : i32
    return %arg0, %c0_i32 : i32, i32
  }
}

</mosaic_0001>

<bundles_post_ra>
// kernel: patch_embed.1
= control target key start
LH: loop header
LB: loop body
LE: loop exit
PB: predicated region body
PF: predicated region fallthrough
CT: control target
= control target key end

     0   :  { %s747_s12 = smov 0   ;;  %s871_s0 = inlined_call_operand.vmem [shape: bf16[16,512], index: 0, kind: input, shape index: {}]   ;;  %s872_s1 = inlined_call_operand.vmem [shape: bf16[512,128], index: 1, kind: input, shape index: {}]   ;;  %s873_s2 = inlined_call_operand.vmem [shape: f32[1,128], index: 2, kind: input, shape index: {}]   ;;  %s874_s3 = inlined_call_operand.vmem [shape: f32[16,128], index: 3, kind: output, shape index: {}]  }
   0x1 LB: > { %s583_s13 = sadd.s32 4294967295, %s725_s12   ;;  %p587_p0 = scmp.ge.s32.totalorder %s725_s12, 1  ;;  %s725_s12 = sphi %s747_s12, %s13_s12  }
   0x2   : > { %p137_p1 = scmp.lt.s32.totalorder %s725_s12, 3 }
   0x4   : > { %p138_p2 = pnand %p587_p0, %p137_p1 }
   0x5   : > { %v683_v0 = vld [vmem:[%s872_s1 + $0x40] sm:$0xff] (!%p138_p2)   ;;  %v687_v4 = vld [vmem:[%s872_s1 + $0x48] sm:$0xff] (!%p138_p2)   ;;  %v691_v8 = vld [vmem:[%s872_s1 + $0x50] sm:$0xff] (!%p138_p2)   ;;  %p160_p3 = scmp.lt.s32.totalorder (!%p138_p2), %s583_s13, 1 }
   0x6   : > { %141 = sbr.rel (%p138_p2) target bundleno = 259 (0x103), region = 32  ;;  %v684_v1 = vld [vmem:[%s872_s1 + $0xc0] sm:$0xff] (!%p138_p2)   ;;  %631 = vmatprep.subr.bf16.mxu0 (!%p138_p2), %v683_v0  ;;  %v688_v5 = vld [vmem:[%s872_s1 + $0xc8] sm:$0xff] (!%p138_p2)   ;;  %v692_v9 = vld [vmem:[%s872_s1 + $0xd0] sm:$0xff] (!%p138_p2)  }
   0x7   : > { %v685_v2 = vld [vmem:[%s872_s1] sm:$0xff] (!%p138_p2)   ;;  %653 = vmatprep.subr.bf16.mxu1 (!%p138_p2), %v684_v1  ;;  %v689_v6 = vld [vmem:[%s872_s1 + $0x8] sm:$0xff] (!%p138_p2)   ;;  %v693_v10 = vld [vmem:[%s872_s1 + $0x10] sm:$0xff] (!%p138_p2)  }
   0x8   : > { %v686_v3 = vld [vmem:[%s872_s1 + $0x80] sm:$0xff] (!%p138_p2)   ;;  %632 = vmatpush3.bf16.msra.mxu0 (!%p138_p2), %v685_v2  ;;  %v690_v7 = vld [vmem:[%s872_s1 + $0x88] sm:$0xff] (!%p138_p2)   ;;  %v694_v11 = vld [vmem:[%s872_s1 + $0x90] sm:$0xff] (!%p138_p2)  }
   0x9   : > { %654 = vmatpush3.bf16.msra.mxu1 (!%p138_p2), %v686_v3  ;;  %633 = vmatprep.subr.bf16.mxu0 (!%p138_p2), %v687_v4  ;;  %v695_v12 = vld [vmem:[%s872_s1 + $0x58] sm:$0xff] (!%p138_p2)   ;;  %v699_v16 = vld [vmem:[%s872_s1 + $0x60] sm:$0xff] (!%p138_p2)   ;;  %v703_v20 = vld [vmem:[%s872_s1 + $0x68] sm:$0xff] (!%p138_p2)  }
   0xa   : > { %655 = vmatprep.subr.bf16.mxu1 (!%p138_p2), %v688_v5  ;;  %v696_v13 = vld [vmem:[%s872_s1 + $0xd8] sm:$0xff] (!%p138_p2)   ;;  %v700_v17 = vld [vmem:[%s872_s1 + $0xe0] sm:$0xff] (!%p138_p2)   ;;  %v704_v21 = vld [vmem:[%s872_s1 + $0xe8] sm:$0xff] (!%p138_p2)  }
   0xb   : > { %v697_v14 = vld [vmem:[%s872_s1 + $0x18] sm:$0xff] (!%p138_p2)   ;;  %v701_v18 = vld [vmem:[%s872_s1 + $0x20] sm:$0xff] (!%p138_p2)   ;;  %v705_v22 = vld [vmem:[%s872_s1 + $0x28] sm:$0xff] (!%p138_p2)  }
   0xc   : > { %634 = vmatpush3.bf16.msra.mxu0 (!%p138_p2), %v689_v6  ;;  %v698_v15 = vld [vmem:[%s872_s1 + $0x98] sm:$0xff] (!%p138_p2)   ;;  %v702_v19 = vld [vmem:[%s872_s1 + $0xa0] sm:$0xff] (!%p138_p2)   ;;  %v706_v23 = vld [vmem:[%s872_s1 + $0xa8] sm:$0xff] (!%p138_p2)  }
   0xd   : > { %656 = vmatpush3.bf16.msra.mxu1 %v690_v7  ;;  %635 = vmatprep.subr.bf16.mxu0 %v691_v8  ;;  %s876_s13 = smov (!%p160_p3, %s583_s13), 1  ;;  %v707_v24 = vld [vmem:[%s872_s1 + $0x70] sm:$0xff]   ;;  %v711_v28 = vld [vmem:[%s872_s1 + $0x78] sm:$0xff]   ;;  %v591_v40 = vld [vmem:[%s873_s2] ss:$0 sm:$0xff] }
   0xe   : > { %657 = vmatprep.subr.bf16.mxu1 %v692_v9  ;;  %v708_v25 = vld [vmem:[%s872_s1 + $0xf0] sm:$0xff]   ;;  %s630_s18 = sshll.u32 %s876_s13, 4  ;;  %v712_v29 = vld [vmem:[%s872_s1 + $0xf8] sm:$0xff]   ;;  %s590_s7 = sshll.u32 %s876_s13, 3 }
   0xf   : > { %v709_v26 = vld [vmem:[%s872_s1 + $0x30] sm:$0xff]   ;;  %s164_s27 = scalar_lea.vmem %s871_s0, %s630_s18  ;;  %v713_v30 = vld [vmem:[%s872_s1 + $0x38] sm:$0xff]   ;;  %s168_s10 = scalar_lea.vmem %s874_s3, %s590_s7 }
  0x10   : > { %636 = vmatpush3.bf16.msra.mxu0 %v693_v10  ;;  %v710_v27 = vld [vmem:[%s872_s1 + $0xb0] sm:$0xff]   ;;  %v714_v31 = vld [vmem:[%s872_s1 + $0xb8] sm:$0xff]   ;;  %v170_v32 = vld [vmem:[%s164_s27] sm:$0xff] }
  0x11   : > { %658 = vmatpush3.bf16.msra.mxu1 %v694_v11  ;;  %637 = vmatprep.subr.bf16.mxu0 %v695_v12  ;;  %v171_v33 = vld [vmem:[%s164_s27 + $0x8] sm:$0xff]  ;;  %v592_v34 = vcombine.low %v170_v32, %v170_v32  ;;  %v593_v35 = vcombine.high %v170_v32, %v170_v32 }
  0x12   : > { %659 = vmatprep.subr.bf16.mxu1 %v696_v13  ;;  %v594_v36 = vcombine.low %v171_v33, %v171_v33  ;;  %v595_v37 = vcombine.high %v171_v33, %v171_v33 }
  0x13   : > { %481 = vmatprep.mubr.bf16.mxu0 %v593_v35 }
  0x14   : > { %638 = vmatpush3.bf16.msra.mxu0 %v697_v14  ;;  %521 = vmatprep.mubr.bf16.mxu1 %v595_v37 }
  0x15   : > { %660 = vmatpush3.bf16.msra.mxu1 %v698_v15  ;;  %639 = vmatprep.subr.bf16.mxu0 %v699_v16 }
  0x16   : > { %661 = vmatprep.subr.bf16.mxu1 %v700_v17 }
  0x18   : > { %640 = vmatpush3.bf16.msra.mxu0 %v701_v18 }
  0x19   : > { %662 = vmatpush3.bf16.msra.mxu1 %v702_v19  ;;  %641 = vmatprep.subr.bf16.mxu0 %v703_v20 }
  0x1a   : > { %663 = vmatprep.subr.bf16.mxu1 %v704_v21 }
  0x1c   : > { %642 = vmatpush3.bf16.msra.mxu0 %v705_v22 }
  0x1d   : > { %664 = vmatpush3.bf16.msra.mxu1 %v706_v23  ;;  %643 = vmatprep.subr.bf16.mxu0 %v707_v24 }
  0x1e   : > { %665 = vmatprep.subr.bf16.mxu1 %v708_v25 }
  0x20   : > { %644 = vmatpush3.bf16.msra.mxu0 %v709_v26 }
  0x21   : > { %666 = vmatpush3.bf16.msra.mxu1 %v710_v27  ;;  %645 = vmatprep.subr.bf16.mxu0 %v711_v28 }
  0x22   : > { %667 = vmatprep.subr.bf16.mxu1 %v712_v29 }
  0x24   : > { %646 = vmatpush3.bf16.msra.mxu0 %v713_v30 }
  0x25   : > { %668 = vmatpush3.bf16.msra.mxu1 %v714_v31 }
  0x27   : > { %482 = vmatmul.mubr.bf16.vlgmr.msra.gmra.mrb[0].mxu0 %v592_v34 }
  0x28   : > { %522 = vmatmul.mubr.bf16.vlgmr.msra.gmra.mrb[0].mxu1 %v594_v36 }
  0xfa   : > { %v647_v38 = vpop.f32.mrb[0].mxu0 }
  0xfb   : > { %v669_v39 = vpop.f32.mrb[0].mxu1  ;;  %v648_v41 = vpop.f32.mrb[1].mxu0 }
  0xfc   : > { %v670_v42 = vpop.f32.mrb[1].mxu1  ;;  %v649_v43 = vadd.f32 %v648_v41, %v647_v38  ;;  %v650_v45 = vpop.f32.mrb[2].mxu0 }
  0xfd   : > { %v671_v44 = vadd.f32 %v670_v42, %v669_v39  ;;  %v672_v46 = vpop.f32.mrb[2].mxu1  ;;  %v651_v47 = vpop.f32.mrb[3].mxu0 }
  0xfe   : > { %v673_v48 = vpop.f32.mrb[3].mxu1  ;;  %v484_v49 = vadd.f32 %v649_v43, %v591_v40 }
 0x100   : > { %v524_v50 = vadd.f32 %v671_v44, %v484_v49 }
 0x102   : > { %529 = vst [vmem:[%s168_s10] sm:$0xff] %v524_v50 }
 0x103 PF: > { %s13_s12 = sadd.s32 1, %s725_s12  }
 0x104   : > { %p10_p4 = scmp.ge.s32.totalorder %s13_s12, 4  }
 0x106   :  { %12 = sbr.rel (!%p10_p4) target bundleno = 1 (0x1), region = 62 }

</bundles_post_ra>
